<compile_context>
chip_gen: v5e
topology: v5e:2x2
jax: 0.10.0
libtpu: 0.0.40
codegen_flags: <defaults>
</compile_context>

<pallas_src>
from functools import partial

import jax
import jax.numpy as jnp
from jax.experimental import pallas as pl
from jax.experimental.pallas import tpu as pltpu


def _layer_norm_kernel(*refs, inv_c, eps, has_bias):
    if has_bias:
        x_ref, g_ref, b_ref, o_ref = refs
    else:
        x_ref, g_ref, o_ref = refs
        b_ref = None

    x = x_ref[...].astype(jnp.float32)                   # (1, C, T)

    # Single-pass mean / variance over the channel (sublane) axis.
    s1 = jnp.sum(x, axis=1, keepdims=True)               # (1, 1, T)
    s2 = jnp.sum(x * x, axis=1, keepdims=True)           # (1, 1, T)
    mean = s1 * inv_c
    var = jnp.maximum(s2 * inv_c - mean * mean, 0.0)     # clamp: cancellation safety

    g = g_ref[...].astype(jnp.float32)                   # (1, C, 1) -> broadcasts
    y = (x - mean) * jax.lax.rsqrt(var + eps) * g
    if b_ref is not None:
        y = y + b_ref[...].astype(jnp.float32)
    o_ref[...] = y.astype(o_ref.dtype)


def _vmem_capacity_bytes():
    """Physical VMEM per TensorCore; conservative (v7x = 64 MiB) fallback."""
    try:
        info = pltpu.get_tpu_info()
        cap = getattr(info, "vmem_capacity_bytes", None)
        if cap:
            return int(cap)
    except Exception:
        pass
    return 64 << 20


def _pick_spatial_tile(N, B, C, itemsize, vmem_budget, max_tile=8192):
    """128-multiple lane tile sized from the VMEM budget and shape, not just N."""
    # Tiny spatial extent: keep the full (sub-128) lane width in one block.
    # TODO(synk): for H*W <= 64 a transposed layout (C on the lane axis) would
    # give denser stores; not needed for the shapes exercised here.
    if N <= 128:
        return N

    # Per lane column: in + out tiles double-buffered (model dtype) plus ~3
    # full-tile f32 temporaries inside the kernel (astype / x*x / y).
    per_col = C * (4 * itemsize + 3 * 4)
    by_vmem = max(128, (vmem_budget // per_col) // 128 * 128)
    n_pad = ((N + 127) // 128) * 128
    tile = int(min(by_vmem, n_pad, max_tile))

    # Keep enough grid steps to pipeline DMA/compute and feed both v7x TCs.
    min_total_steps = 4
    while tile > 128 and B * ((N + tile - 1) // tile) < min_total_steps:
        tile = max(128, ((tile // 2) // 128) * 128)
    return tile


def layer_norm(x, g, b=None):
    """Channel LayerNorm for NCHW `x`; g (and optional b) shaped (1, C, 1, 1)."""
    B, C, H, W = x.shape
    N = H * W
    eps = 1e-5 if x.dtype == jnp.float32 else 1e-3
    itemsize = jnp.dtype(x.dtype).itemsize

    x3 = x.reshape(B, C, N)
    g3 = g.reshape(1, C, 1)
    has_bias = b is not None

    phys_vmem = _vmem_capacity_bytes()
    budget = min(phys_vmem // 2, 48 << 20)          # working-set budget for tiling
    vmem_limit = int(min(phys_vmem * 3 // 4, 96 << 20))

    tile_n = _pick_spatial_tile(N, B, C, itemsize, budget)
    grid = (B, pl.cdiv(N, tile_n))

    data_spec = pl.BlockSpec((1, C, tile_n), lambda b_, i: (b_, 0, i))
    param_spec = pl.BlockSpec((1, C, 1), lambda b_, i: (0, 0, 0))

    in_specs = [data_spec, param_spec]
    operands = [x3, g3]
    if has_bias:
        in_specs.append(param_spec)
        operands.append(b.reshape(1, C, 1))

    kernel = partial(_layer_norm_kernel, inv_c=1.0 / C, eps=eps, has_bias=has_bias)

    cost = pl.CostEstimate(
        flops=6 * B * C * N,
        transcendentals=B * N,
        bytes_accessed=2 * B * C * N * itemsize,
    )

    out = pl.pallas_call(
        kernel,
        out_shape=jax.ShapeDtypeStruct((B, C, N), x.dtype),
        grid=grid,
        in_specs=in_specs,
        out_specs=data_spec,
        compiler_params=pltpu.CompilerParams(
            dimension_semantics=("parallel", "parallel"),
            vmem_limit_bytes=vmem_limit,
        ),
        cost_estimate=cost,
    )(*operands)
    return out.reshape(B, C, H, W)


def reference(x, g, b=None):
    """Pure-JAX mirror of the PyTorch LayerNorm.forward."""
    eps = 1e-5 if x.dtype == jnp.float32 else 1e-3
    xf = x.astype(jnp.float32)
    mean = xf.mean(axis=1, keepdims=True)
    var = ((xf - mean) ** 2).mean(axis=1, keepdims=True)      # unbiased=False
    y = (xf - mean) * jax.lax.rsqrt(var + eps) * g.astype(jnp.float32)
    if b is not None:
        y = y + b.astype(jnp.float32)
    return y.astype(x.dtype)


def _check(x, g, b, rtol, atol, tag):
    out = jax.block_until_ready(layer_norm(x, g, b))
    ref = reference(x, g, b)
    assert out.shape == x.shape
    err = jnp.max(jnp.abs(out.astype(jnp.float32) - ref.astype(jnp.float32)))
    assert jnp.allclose(out.astype(jnp.float32), ref.astype(jnp.float32),
                        rtol=rtol, atol=atol), f"{tag}: max abs err = {err}"


if __name__ == "__main__":
    key = jax.random.PRNGKey(0)
    kx, kg, kb, kx2, kx3 = jax.random.split(key, 5)

    # Primary module configuration: bias=False, f32, B=2 C=4 H=W=16.
    B, C, H, W = 2, 4, 16, 16
    x = jax.random.normal(kx, (B, C, H, W), dtype=jnp.float32)
    g = 1.0 + 0.1 * jax.random.normal(kg, (1, C, 1, 1), dtype=jnp.float32)
    b = 0.1 * jax.random.normal(kb, (1, C, 1, 1), dtype=jnp.float32)

    _check(x, g, None, 1e-4, 1e-4, "f32 bias=False")
    _check(x, g, b, 1e-4, 1e-4, "f32 bias=True")

    # Non-128-multiple spatial extent (exercises the cdiv / partial-last-block path).
    x2 = jax.random.normal(kx2, (B, C, 15, 15), dtype=jnp.float32)
    _check(x2, g, None, 1e-4, 1e-4, "f32 15x15")

    # bf16 input (eps = 1e-3 path, bf16 I/O with f32 in-register stats).
    Cb = 8
    xb = jax.random.normal(kx3, (B, Cb, H, W), dtype=jnp.bfloat16)
    gb = jnp.ones((1, Cb, 1, 1), dtype=jnp.bfloat16)
    _check(xb, gb, None, 3e-2, 3e-2, "bf16 bias=False")

    print("KERNEL_OK")
</pallas_src>

<mosaic_0001>
module attributes {stable_mosaic.version = 11 : i64} {
  func.func @_layer_norm_kernel(%arg0: i32, %arg1: i32, %arg2: memref<1x4x128xf32, #tpu.memory_space<vmem>>, %arg3: memref<1x4x1xf32, #tpu.memory_space<vmem>>, %arg4: memref<1x4x128xf32, #tpu.memory_space<vmem>>) attributes {dimension_semantics = [#tpu.dimension_semantics<parallel>, #tpu.dimension_semantics<parallel>], iteration_bounds = array<i64: 2, 2>, scalar_prefetch = 0 : i64, scratch_operands = 0 : i64, tpu.core_type = #tpu.core_type<tc>, window_params = [{transform_indices = @transform_0, window_bounds = array<i64: 1, 4, 128>}, {pipeline_mode = #tpu.pipeline_mode<synchronous>, transform_indices = @transform_1, window_bounds = array<i64: 1, 4, 1>}, {transform_indices = @transform_2, window_bounds = array<i64: 1, 4, 128>}]} {
    %c0 = arith.constant 0 : index
    %c0_0 = arith.constant 0 : index
    %c0_1 = arith.constant 0 : index
    %0 = vector.load %arg2[%c0, %c0_0, %c0_1] : memref<1x4x128xf32, #tpu.memory_space<vmem>>, vector<1x4x128xf32>
    %cst = arith.constant dense<0.000000e+00> : vector<1x128xf32>
    %1 = vector.multi_reduction <add>, %0, %cst [1] : vector<1x4x128xf32> to vector<1x128xf32>
    %2 = vector.shape_cast %1 : vector<1x128xf32> to vector<1x1x128xf32>
    %3 = arith.mulf %0, %0 : vector<1x4x128xf32>
    %cst_2 = arith.constant dense<0.000000e+00> : vector<1x128xf32>
    %4 = vector.multi_reduction <add>, %3, %cst_2 [1] : vector<1x4x128xf32> to vector<1x128xf32>
    %5 = vector.shape_cast %4 : vector<1x128xf32> to vector<1x1x128xf32>
    %cst_3 = arith.constant 2.500000e-01 : f32
    %6 = vector.broadcast %cst_3 : f32 to vector<1x1x128xf32>
    %7 = arith.mulf %2, %6 : vector<1x1x128xf32>
    %cst_4 = arith.constant 2.500000e-01 : f32
    %8 = vector.broadcast %cst_4 : f32 to vector<1x1x128xf32>
    %9 = arith.mulf %5, %8 : vector<1x1x128xf32>
    %10 = arith.mulf %7, %7 : vector<1x1x128xf32>
    %11 = arith.subf %9, %10 : vector<1x1x128xf32>
    %cst_5 = arith.constant 0.000000e+00 : f32
    %12 = vector.broadcast %cst_5 : f32 to vector<1x1x128xf32>
    %13 = arith.maximumf %11, %12 : vector<1x1x128xf32>
    %c0_6 = arith.constant 0 : index
    %c0_7 = arith.constant 0 : index
    %c0_8 = arith.constant 0 : index
    %14 = vector.load %arg3[%c0_6, %c0_7, %c0_8] : memref<1x4x1xf32, #tpu.memory_space<vmem>>, vector<1x4x1xf32>
    %15 = vector.broadcast %7 : vector<1x1x128xf32> to vector<1x4x128xf32>
    %16 = arith.subf %0, %15 : vector<1x4x128xf32>
    %cst_9 = arith.constant 9.99999974E-6 : f32
    %17 = vector.broadcast %cst_9 : f32 to vector<1x1x128xf32>
    %18 = arith.addf %13, %17 : vector<1x1x128xf32>
    %19 = math.rsqrt %18 : vector<1x1x128xf32>
    %20 = vector.broadcast %19 : vector<1x1x128xf32> to vector<1x4x128xf32>
    %21 = arith.mulf %16, %20 : vector<1x4x128xf32>
    %22 = vector.broadcast %14 : vector<1x4x1xf32> to vector<1x4x128xf32>
    %23 = arith.mulf %21, %22 : vector<1x4x128xf32>
    %c0_10 = arith.constant 0 : index
    %c0_11 = arith.constant 0 : index
    %c0_12 = arith.constant 0 : index
    %24 = vector.load %arg4[%c0_10, %c0_11, %c0_12] : memref<1x4x128xf32, #tpu.memory_space<vmem>>, vector<1x4x128xf32>
    tpu.vector_store %arg4[%c0_10, %c0_11, %c0_12], %23 {strides = array<i32>} : memref<1x4x128xf32, #tpu.memory_space<vmem>>, vector<1x4x128xf32>,
    return
  }
  func.func @transform_0(%arg0: i32, %arg1: i32) -> (i32, i32, i32) {
    %c0_i32 = arith.constant 0 : i32
    %c0_i32_0 = arith.constant 0 : i32
    return %arg0, %c0_i32, %arg1 : i32, i32, i32
  }
  func.func @transform_1(%arg0: i32, %arg1: i32) -> (i32, i32, i32) {
    %c0_i32 = arith.constant 0 : i32
    %c0_i32_0 = arith.constant 0 : i32
    %c0_i32_1 = arith.constant 0 : i32
    %c0_i32_2 = arith.constant 0 : i32
    return %c0_i32, %c0_i32_0, %c0_i32_1 : i32, i32, i32
  }
  func.func @transform_2(%arg0: i32, %arg1: i32) -> (i32, i32, i32) {
    %c0_i32 = arith.constant 0 : i32
    %c0_i32_0 = arith.constant 0 : i32
    return %arg0, %c0_i32, %arg1 : i32, i32, i32
  }
}

</mosaic_0001>

<bundles_post_ra>
// kernel: tpu_custom_call.1
= control target key start
LH: loop header
LB: loop body
LE: loop exit
PB: predicated region body
PF: predicated region fallthrough
CT: control target
= control target key end

     0   :  { %7 = vsyncpa [#allocation3], 0  ;;  %s717_s0 = inlined_call_operand.hbm [shape: f32[2,4,256], index: 0, kind: input, shape index: {}]   ;;  %s718_s1 = inlined_call_operand.vmem [shape: f32[1,4,1], index: 1, kind: input, shape index: {}]   ;;  %s719_s2 = inlined_call_operand.hbm [shape: f32[2,4,256], index: 2, kind: output, shape index: {}]  }
   0x1   :  { %9 = vsyncpa [#allocation3 + $0x1], 0 }
   0x2   :  { %10 = vsyncpa [#allocation4], 0 }
   0x3   :  { %12 = vsyncpa [#allocation4 + $0x1], 0  ;;  %s568_s9 = smov 0   ;;  %s570_s10 = smov 0  }
   0x4   :  { %s572_s11 = smov 0   ;;  %s574_s12 = smov 0  }
   0x5   :  { %s576_s13 = smov 0   ;;  %s578_s14 = smov 0  }
   0x6   :  { %s580_s15 = smov 0   ;;  %s582_s16 = smov 0  }
   0x7 LB: > { %s325_s17 = sadd.s32 4294967295, %s550_s16   ;;  %s326_s18 = sadd.s32 4294967294, %s550_s16   ;;  %s550_s16 = sphi %s582_s16, %s18_s16   ;;  %s546_s15 = sphi %s580_s15, %s730_s15   ;;  %s542_s14 = sphi %s578_s14, %s729_s14   ;;  %s538_s13 = sphi %s576_s13, %s728_s13   ;;  %s534_s12 = sphi %s574_s12, %s727_s12   ;;  %s530_s11 = sphi %s572_s11, %s726_s11   ;;  %s526_s10 = sphi %s570_s10, %s725_s10   ;;  %s522_s9 = sphi %s568_s9, %s724_s9  }
   0x8   : > { %s27_s19 = sadd.s32 1, %s542_s14  ;;  %s30_s20 = sadd.s32 1, %s546_s15 }
   0x9   : > { %p28_p0 = scmp.ge.s32.totalorder %s27_s19, 2  ;;  %s39_s21 = sadd.s32 1, %s530_s11 }
   0xa   : > { %p46_p1 = scmp.ne.s32.totalorder %s530_s11, %s526_s10  ;;  %p47_p2 = scmp.eq.s32.totalorder %s550_s16, 0 }
   0xb   : > { %s732_s19 = smov (%p28_p0, %s27_s19), 0  ;;  %s734_s20 = smov (!%p28_p0, %s30_s20), %s546_s15 }
   0xc   : > { %s35_s22 = ssub.s32 %s542_s14, %s732_s19  ;;  %p621_p3 = por %p47_p2, %p46_p1 }
   0xd   : > { %p32_p4 = scmp.ge.s32.totalorder %s734_s20, 2  ;;  %p52_p5 = scmp.ne.s32.totalorder %s526_s10, %s522_s9 }
   0xe   : > { %p53_p6 = scmp.eq.s32.totalorder %s325_s17, 0  ;;  %p99_p7 = scmp.eq.s32.totalorder %s325_s17, 3 }
   0xf   : > { %s736_s20 = smov (%p32_p4, %s734_s20), 0  ;;  %p105_p10 = scmp.eq.s32.totalorder %s326_s18, 3 }
  0x10   : > { %p629_p8 = por %p53_p6, %p52_p5  ;;  %p633_p9 = por %p99_p7, %p46_p1 }
  0x11   : > { %s34_s26 = ssub.s32 %s546_s15, %s736_s20  ;;  %p639_p12 = por %p105_p10, %p52_p5 }
  0x12   : > { %s36_s27 = sor.u32 %s35_s22, %s34_s26  ;;  %p352_p13 = scmp.lt.s32.totalorder %s550_s16, 4 }
  0x13   : > { %p37_p11 = scmp.eq.s32.totalorder %s36_s27, 0  ;;  %s128_s29 = sand.u32 1, %s530_s11  }
  0x14   : > { %s329_s3 = sshll.u32 %s128_s29, 2  ;;  %s330_s4 = sshll.u32 %s546_s15, 1 }
  0x15   : > { %s646_s30 = scalar_select %p37_p11, %s530_s11, %s39_s21  }
  0x16   : > { %s136_s5 = sadd.s32 %s542_s14, %s330_s4  ;;  %s132_s6 = scalar_lea.vmem [#allocation2], %s329_s3 }
  0x17   : > { %s142_s7 = sshll.u32 %s132_s6, 4  ;;  %s331_s8 = sshll.u32 %s136_s5, 2  ;;  %s143_s7 = int_to_ptr.vmem [resolvable:$true] %s142_s7 }
  0x18   : > { %s138_s22 = scalar_lea.hbm %s717_s0, %s331_s8  ;;  %p345_p0 = pnand %p352_p13, %p621_p3 }
  0x19   : > { %s140_s26 = sshll.u32 %s138_s22, 4  ;;  %p332_p1 = scmp.ge.s32.totalorder %s550_s16, 1  ;;  %s141_s26 = int_to_ptr.hbm [resolvable:$true] %s140_s26 }
  0x1a   : > { %s129_s27 = scalar_lea.sflag [#allocation3], %s128_s29  ;;  %p147_p2 = scmp.lt.s32.totalorder %s550_s16, 5 }
  0x1b   : > { %347 = dma.hbm_to_vmem [thread:$0]  (!%p345_p0), %s141_s26, 64, %s143_s7, %s129_s27  }
  0x1c   : > { %p148_p4 = pnand %p332_p1, %p147_p2 }
  0x1d   : > { %s658_s21 = sand.u32 (!%p148_p4), 1, %s526_s10  }
  0x1e   : > { %151 = sbr.rel (%p148_p4) target bundleno = 158 (0x9e), region = 28  ;;  %s333_s3 = sshll.u32 (!%p148_p4), %s658_s21, 2 }
  0x1f   : > { %s154_s4 = scalar_lea.sflag (!%p148_p4), [#allocation3], %s658_s21  ;;  %s157_s23 = scalar_lea.vmem (!%p148_p4), [#allocation2], %s333_s3 }
  0x23   : > { %513 = dma.done.wait (%p629_p8), %s154_s4, 64  }
  0x24   : > { %515 = vsyncadd (%p629_p8), %s154_s4, 4294967232  ;;  %v552_v0 = vmov 0   ;;  %v201_v1 = vld [vmem:[%s718_s1] sm:$0xf]  ;;  %vm180_vm0 = vcmask 1043456   ;;  %s336_s24 = sshll.u32 %s538_s13, 1 }
  0x25   : > { %419 = vset.pattern.permute.xlu0 %v552_v0  ;;  %v179_v2 = vld [vmem:[%s157_s23] sm:$0xf]  ;;  %s233_s6 = sadd.s32 %s534_s12, %s336_s24  ;;  %s178_s22 = scalar_lea.vmem [#allocation5], %s333_s3 }
  0x26   : > { %217 = vperm.xlu0 %419, %v201_v1   ;;  %v181_v3 = vsel %vm180_vm0, %v179_v2, 0.0  ;;  %v188_v4 = vmul.f32 %v179_v2, %v179_v2  ;;  %s337_s7 = sshll.u32 %s233_s6, 2  ;;  %s237_s26 = sshll.u32 %s178_s22, 4  ;;  %s238_s26 = int_to_ptr.vmem [resolvable:$true] %s237_s26 }
  0x27   : > { %v182_v5 = vrot.slane %v181_v3, 4  ;;  %s235_s18 = scalar_lea.hbm %s719_s2, %s337_s7  ;;  %s223_s12 = scalar_lea.sflag [#allocation4], %s658_s21 }
  0x28   : > { %v189_v6 = vsel %vm180_vm0, %v188_v4, 0.0  ;;  %s239_s27 = sshll.u32 %s235_s18, 4  ;;  %s472_s5 = scalar_lea.hbm %s719_s2, 16  ;;  %s240_s27 = int_to_ptr.hbm [resolvable:$true] %s239_s27 }
  0x29   : > { %v183_v7 = vadd.f32 %v182_v5, %v181_v3  ;;  %v190_v8 = vrot.slane %v189_v6, 4  ;;  %s466_s13 = sshra.s32 %s240_s27, 4  ;;  %s467_s13 = int_to_ptr.hbm [resolvable:$true] %s466_s13 }
  0x2a   : > { %s468_s4 = scalar_lea.hbm %s467_s13, 4  ;;  %p473_p7 = scmp.lt.s32.totalorder %s467_s13, %s719_s2 }
  0x2b   : > { %v184_v9 = vrot.slane %v183_v7, 2  ;;  %v191_v10 = vadd.f32 %v190_v8, %v189_v6  ;;  %p469_p3 = scmp.ne.s32.totalorder %s467_s13, %s468_s4  ;;  %p474_p8 = scmp.lt.s32.totalorder %s472_s5, %s468_s4 }
  0x2d   : > { %v185_v11 = vadd.f32 %v184_v9, %v183_v7  ;;  %v192_v12 = vrot.slane %v191_v10, 2  ;;  %p470_p5 = pnand %p469_p3, %p633_p9  ;;  %p475_p10 = por %p474_p8, %p473_p7 }
  0x2f   : > { %v186_v13 = vrot.slane %v185_v11, 1  ;;  %v193_v14 = vadd.f32 %v192_v12, %v191_v10  ;;  %p471_p6 = pneg %p470_p5 }
  0x31   : > { %v187_v15 = vadd.f32 %v186_v13, %v185_v11  ;;  %v194_v16 = vrot.slane %v193_v14, 1  ;;  %p476_p11 = pnand %p475_p10, %p471_p6 }
  0x33   : > { %v195_v17 = vadd.f32 %v194_v16, %v193_v14  ;;  %v196_v18 = vmul.f32 0.25, %v187_v15 }
  0x35   : > { %v197_v19 = vmul.f32 0.25, %v195_v17  ;;  %v198_v20 = vmul.f32 %v196_v18, %v196_v18  ;;  %v202_v30 = vsub.f32 %v179_v2, %v196_v18 }
  0x37   : > { %v199_v21 = vsub.f32 %v197_v19, %v198_v20 }
  0x39   : > { %v200_v22 = vmax.f32 %v199_v21, 0.0 }
  0x3b   : > { %v203_v23 = vadd.f32 1e-05, %v200_v22 }
  0x3d   : > { %420 = vrsqrt.f32 %v203_v23  ;;  %vm210_vm1 = vweird.f32 %v203_v23 }
  0x43   : > { %v421_v24 = vpop.eup %420 }
  0x44   : > { %v205_v25 = vmul.f32 %v421_v24, %v203_v23  ;;  %vm211_vm2 = vweird.f32 %v421_v24 }
  0x45   : > { %vm212_vm3 = vmor %vm210_vm1, %vm211_vm2 }
  0x46   : > { %v206_v26 = vmul.f32 %v421_v24, %v205_v25 }
  0x48   : > { %v207_v27 = vmul.f32 0.5, %v206_v26 }
  0x4a   : > { %v208_v28 = vsub.f32 1.5, %v207_v27 }
  0x4c   : > { %v209_v29 = vmul.f32 %v421_v24, %v208_v28 }
  0x4e   : > { %v213_v31 = vsel %vm212_vm3, %v421_v24, %v209_v29 }
  0x4f   : > { %v214_v32 = vmul.f32 %v213_v31, %v202_v30 }
  0x98   : > { %v218_v33 = vpop.permute.xlu0 %217 }
  0x99   : > { %v220_v34 = vmul.f32 %v218_v33, %v214_v32 }
  0x9b   : > { %221 = vst [vmem:[%s178_s22] sm:$0xf] %v220_v34 }
  0x9c   : > { %479 = shalt.err (!%p476_p11)
}
  0x9d   : > { %342 = dma.vmem_to_hbm [thread:$0]  (%p633_p9), %s238_s26, 64, %s240_s27, %s223_s12  }
  0x9e PF: > { %p353_p13 = scmp.ge.s32.totalorder %s550_s16, 2  ;;  %s251_s21 = sand.u32 1, %s522_s9  }
  0x9f   : > { %s252_s6 = scalar_lea.sflag [#allocation4], %s251_s21 }
  0xa0   : > { %p349_p0 = pnand %p353_p13, %p639_p12 }
  0xa2   : > { %p350_p1 = pneg %p349_p0 }
  0xa4   : > { %517 = dma.done.wait (%p350_p1), %s252_s6, 64  }
  0xa5   : > { %519 = vsyncadd (%p350_p1), %s252_s6, 4294967232  ;;  %s18_s16 = sadd.s32 1, %s550_s16   ;;  %s724_s9 = smov %s526_s10 }
  0xa6   : > { %p15_p2 = scmp.ge.s32.totalorder %s18_s16, 6   ;;  %s725_s10 = smov %s530_s11 }
  0xa7   : > { %s726_s11 = smov %s646_s30  ;;  %s727_s12 = smov %s542_s14 }
  0xa8   : > { %s728_s13 = smov %s546_s15  ;;  %s729_s14 = smov %s732_s19 }
  0xa9   : > { %s730_s15 = smov %s736_s20  ;;  %17 = sbr.rel (!%p15_p2) target bundleno = 7 (0x7), region = 73 }
  0xae   :  { %258 = vsyncpa [#allocation3], 1 }
  0xaf   :  { %260 = vsyncpa [#allocation3 + $0x1], 1 }
  0xb0   :  { %261 = vsyncpa [#allocation4], 1 }
  0xb1   :  { %263 = vsyncpa [#allocation4 + $0x1], 1 }

</bundles_post_ra>
